<compile_context>
chip_gen: v5e
topology: v5e:2x2
jax: 0.10.0
libtpu: 0.0.40
codegen_flags: <defaults>
</compile_context>

<pallas_src>
import numpy as np
import jax
import jax.numpy as jnp
from jax import lax
from jax.experimental import pallas as pl
from jax.experimental.pallas import tpu as pltpu


def _make_kernel(B, SUB, C_out, K, L1, L2, tap_starts, inv_n1, inv_n2,
                 relu_after_bn, eps):
    n_chunks = -(-B // SUB)

    def stat(v):  # sum over (sublane, lane) -> (1, 1)
        return jnp.sum(jnp.sum(v, axis=1, keepdims=True), axis=0, keepdims=True)

    def layer_norm(v, g, b, inv_n):
        # One-pass statistics, all f32 (inputs already f32); var clamped >= 0.
        s = stat(v)
        ss = stat(v * v)
        mean = s * inv_n
        var = jnp.maximum(ss * inv_n - mean * mean, 0.0)
        return (v - mean) * lax.rsqrt(var + eps) * g + b

    def tap(a, k):
        # Depthwise conv2 tap k == contiguous lane slice of the phase-major
        # layout; out-of-range / padded lanes are killed by the zero lanes that
        # were folded into the w2 slab on the wrapper side.
        s = tap_starts[k]
        if 0 <= s and s + L2 <= L1:
            return lax.slice_in_dim(a, s, s + L2, axis=1)
        rolled = pltpu.roll(a, shift=(-s) % L1, axis=1)   # rare wrap fallback
        return lax.slice_in_dim(rolled, 0, L2, axis=1)

    def kernel(x1_ref, w1_ref, ln1_ref, c2_ref, out_ref):
        w1 = w1_ref[...]                         # (C_out, Kc_pad) compute dtype
        g1, be1 = ln1_ref[0], ln1_ref[1]         # (C_out, L1) f32
        w2 = [c2_ref[k] for k in range(K)]       # masked per-lane taps (C_out, L2)
        b2, g2, be2 = c2_ref[K], c2_ref[K + 1], c2_ref[K + 2]

        for c in range(n_chunks):                # static loop bounds vreg pressure
            b_lo = c * SUB
            nb = min(SUB, B - b_lo)
            # ---- conv1 (+ folded bias): ONE MXU matmul per sub-chunk ----
            xs = x1_ref[:, b_lo * L1:(b_lo + nb) * L1]
            y = jnp.dot(w1, xs, preferred_element_type=jnp.float32)  # (C_out, nb*L1)
            zs = []
            for j in range(nb):                  # per-sample LayerNorm segments
                yb = lax.slice_in_dim(y, j * L1, (j + 1) * L1, axis=1)
                if not relu_after_bn:
                    yb = jnp.maximum(yb, 0.0)
                a = layer_norm(yb, g1, be1, inv_n1)
                if relu_after_bn:
                    a = jnp.maximum(a, 0.0)
                # ---- depthwise conv2 over F: K contiguous lane-slice taps ----
                acc = b2 + w2[0] * tap(a, 0)
                for k in range(1, K):
                    acc = acc + w2[k] * tap(a, k)
                if not relu_after_bn:
                    acc = jnp.maximum(acc, 0.0)
                z = layer_norm(acc, g2, be2, inv_n2)
                if relu_after_bn:
                    z = jnp.maximum(z, 0.0)
                zs.append(z)
            zc = zs[0] if nb == 1 else jnp.concatenate(zs, axis=1)
            # Lane-dense store: nb*L2 lanes (multiple of 128 for full chunks).
            out_ref[:, b_lo * L2:(b_lo + nb) * L2] = zc.astype(out_ref.dtype)

    return kernel


def separable_conv2d(x, params, *, kernel_size, stride, relu_after_bn=False,
                     eps=1e-5, batch_block=32, sub_block=8,
                     compute_dtype=jnp.bfloat16):
    """Pallas implementation of SeparableConv2d.forward (default non-hacked path)."""
    N, C_in, F, T = x.shape
    K = kernel_size
    s0, s1 = stride
    C_out = params["w1"].shape[0]

    # Same padding arithmetic as the PyTorch module __init__.
    p1 = (T - 1) // s0 * s0 + K - T
    p1l, p1r = p1 // 2, p1 - p1 // 2
    T_out = (T - 1) // s0 + 1
    p2 = (F - 1) // s1 * s1 + K - F
    p2_top = p2 // 2
    F2 = (F - 1) // s1 + 1

    Q = -(-F // s1)                      # de-interleaved rows per phase (== F2)
    F_dei = Q * s1
    L1 = s1 * Q * T_out                  # stage-1 per-sample lane width
    L2 = F2 * T_out                      # stage-2 per-sample lane width
    n1 = float(C_out * F * T_out)        # LN1 element count (real lanes only)
    n2 = float(C_out * F2 * T_out)

    # ---- im2col for conv1 (time stride folded in, F de-interleaved by s1) ----
    xp = jnp.pad(x.astype(jnp.float32),
                 ((0, 0), (0, 0), (0, F_dei - F), (p1l, p1r)))
    taps = jnp.stack(
        [xp[:, :, :, k:k + s0 * (T_out - 1) + 1:s0] for k in range(K)], axis=2)
    taps = taps.reshape(N, C_in, K, Q, s1, T_out).transpose(0, 1, 2, 4, 3, 5)
    x1 = taps.reshape(N, C_in * K, L1)

    # Conv1 bias folded into an extra row; the row is 1.0 only on "real" lanes
    # (de-interleave pad lanes get 0) which makes LN1 statistics exact with no
    # in-kernel masking at all.
    real_f = (np.arange(F_dei) < F).astype(np.float32)
    real_lane = np.repeat(real_f.reshape(Q, s1).T.reshape(-1), T_out)   # (L1,)

    Kc = C_in * K
    Kc_pad = -(-(Kc + 1) // 16) * 16     # multiple of 16 (bf16 sublane tile)
    x1 = jnp.pad(x1, ((0, 0), (0, Kc_pad - Kc), (0, 0)))
    x1 = x1.at[:, Kc, :].set(jnp.asarray(real_lane))

    # Batch blocking: B samples per grid step, processed in SUB-sample chunks.
    B = max(1, min(batch_block, N))
    SUB = max(1, min(sub_block, B))
    N_pad = -(-N // B) * B
    if N_pad != N:
        x1 = jnp.pad(x1, ((0, N_pad - N), (0, 0), (0, 0)))
    # (Kc_pad, N_pad*L1): sample-major lanes; bf16 stream for the MXU.
    x1 = x1.astype(compute_dtype).transpose(1, 0, 2).reshape(Kc_pad, N_pad * L1)

    w1m = params["w1"][:, :, 0, :].reshape(C_out, Kc).astype(jnp.float32)
    w1m = jnp.pad(w1m, ((0, 0), (0, Kc_pad - Kc)))
    w1m = w1m.at[:, Kc].set(params["b1"].astype(jnp.float32))
    w1m = w1m.astype(compute_dtype)

    def dei(p):   # (C_out, F, T_out) -> phase-major lane-dense (C_out, L1)
        p = jnp.pad(p.astype(jnp.float32), ((0, 0), (0, F_dei - F), (0, 0)))
        return p.reshape(C_out, Q, s1, T_out).transpose(0, 2, 1, 3).reshape(C_out, L1)

    ln1 = jnp.stack([dei(params["g1"]), dei(params["be1"])], axis=0)   # (2,C_out,L1)

    # conv2 / LN2 constants packed into one slab; the tap boundary masks
    # (conv2 zero padding + de-interleave pad rows) are folded into the w2 lanes.
    w2k = params["w2"][:, 0, :, 0].astype(jnp.float32)                 # (C_out, K)
    tap_starts = []
    rows = []
    for k in range(K):
        d = k - p2_top
        r = d % s1
        dq = (d - r) // s1
        tap_starts.append((r * Q + dq) * T_out)
        valid = np.array([1.0 if (0 <= f2 + dq and s1 * (f2 + dq) + r <= F - 1)
                          else 0.0 for f2 in range(F2)], np.float32)
        rows.append(w2k[:, k:k + 1] * jnp.asarray(np.repeat(valid, T_out))[None, :])
    rows.append(jnp.broadcast_to(params["b2"].astype(jnp.float32)[:, None],
                                 (C_out, L2)))
    rows.append(params["g2"].reshape(C_out, L2).astype(jnp.float32))
    rows.append(params["be2"].reshape(C_out, L2).astype(jnp.float32))
    c2 = jnp.stack(rows, axis=0)                                       # (K+3,C_out,L2)

    kernel = _make_kernel(B, SUB, C_out, K, L1, L2, tuple(tap_starts),
                          1.0 / n1, 1.0 / n2, relu_after_bn, eps)

    out_dtype = x.dtype
    # VMEM budget: double-buffered blocks + headroom (re-derived for v7x 64 MiB).
    blk_bytes = (Kc_pad * B * L1 * np.dtype(compute_dtype).itemsize
                 + C_out * B * L2 * np.dtype(out_dtype).itemsize
                 + C_out * Kc_pad * np.dtype(compute_dtype).itemsize
                 + 2 * C_out * max(L1, 128) * 4
                 + (K + 3) * C_out * max(L2, 128) * 4)
    vmem_limit = int(min(48 * 2**20, max(8 * 2**20, 4 * blk_bytes)))

    grid_spec = pltpu.PrefetchScalarGridSpec(
        num_scalar_prefetch=0,
        grid=(N_pad // B,),
        in_specs=[
            pl.BlockSpec((Kc_pad, B * L1), lambda n: (0, n)),      # im2col slab
            pl.BlockSpec((C_out, Kc_pad), lambda n: (0, 0)),       # w1 (+bias col)
            pl.BlockSpec((2, C_out, L1), lambda n: (0, 0, 0)),     # gamma1/beta1
            pl.BlockSpec((K + 3, C_out, L2), lambda n: (0, 0, 0)), # w2/b2/g2/be2
        ],
        out_specs=pl.BlockSpec((C_out, B * L2), lambda n: (0, n)),
    )

    out2d = pl.pallas_call(
        kernel,
        out_shape=jax.ShapeDtypeStruct((C_out, N_pad * L2), out_dtype),
        grid_spec=grid_spec,
        compiler_params=pltpu.CompilerParams(
            dimension_semantics=("parallel",),   # megacore-shardable at grid >= 2
            vmem_limit_bytes=vmem_limit),
    )(x1, w1m, ln1, c2)

    # Cheap wrapper-side unpack of the lane-dense kernel layout.
    out = out2d.reshape(C_out, N_pad, F2, T_out).transpose(1, 0, 2, 3)
    return out[:N]


def reference(x, params, *, kernel_size, stride, relu_after_bn=False, eps=1e-5):
    """Pure-JAX reference reproducing the PyTorch forward pass."""
    N, C_in, F, T = x.shape
    K = kernel_size
    s0, s1 = stride
    C_out = params["w1"].shape[0]
    p1 = (T - 1) // s0 * s0 + K - T
    p2 = (F - 1) // s1 * s1 + K - F

    def ln(v, g, b):
        m = jnp.mean(v, axis=(1, 2, 3), keepdims=True)
        var = jnp.mean((v - m) ** 2, axis=(1, 2, 3), keepdims=True)
        return (v - m) / jnp.sqrt(var + eps) * g[None] + b[None]

    y = jnp.pad(x, ((0, 0), (0, 0), (0, 0), (p1 // 2, p1 - p1 // 2)))
    y = lax.conv_general_dilated(y, params["w1"], (1, s0), "VALID",
                                 dimension_numbers=("NCHW", "OIHW", "NCHW"))
    y = y + params["b1"][None, :, None, None]
    if relu_after_bn:
        y = jnp.maximum(ln(y, params["g1"], params["be1"]), 0.0)
    else:
        y = ln(jnp.maximum(y, 0.0), params["g1"], params["be1"])

    y = jnp.pad(y, ((0, 0), (0, 0), (p2 // 2, p2 - p2 // 2), (0, 0)))
    z = lax.conv_general_dilated(y, params["w2"], (s1, 1), "VALID",
                                 dimension_numbers=("NCHW", "OIHW", "NCHW"),
                                 feature_group_count=C_out)
    z = z + params["b2"][None, :, None, None]
    if relu_after_bn:
        z = jnp.maximum(ln(z, params["g2"], params["be2"]), 0.0)
    else:
        z = ln(jnp.maximum(z, 0.0), params["g2"], params["be2"])
    return z


if __name__ == "__main__":
    # module hyper-params: in_c=4, out_c=8, kernel_size=3, stride=(2,2),
    # in_f=16, in_t=16, fuller=False, activation=ReLU, relu_after_bn=False
    in_c, out_c, K = 4, 8, 3
    stride = (2, 2)
    in_f, in_t = 16, 16
    N = 2

    T_out = (in_t - 1) // stride[0] + 1   # 8
    F2 = (in_f - 1) // stride[1] + 1      # 8

    keys = jax.random.split(jax.random.PRNGKey(0), 9)
    params = {
        "w1": 0.2 * jax.random.normal(keys[0], (out_c, in_c, 1, K), jnp.float32),
        "b1": 0.1 * jax.random.normal(keys[1], (out_c,), jnp.float32),
        "g1": 1.0 + 0.1 * jax.random.normal(keys[2], (out_c, in_f, T_out), jnp.float32),
        "be1": 0.1 * jax.random.normal(keys[3], (out_c, in_f, T_out), jnp.float32),
        "w2": 0.2 * jax.random.normal(keys[4], (out_c, 1, K, 1), jnp.float32),
        "b2": 0.1 * jax.random.normal(keys[5], (out_c,), jnp.float32),
        "g2": 1.0 + 0.1 * jax.random.normal(keys[6], (out_c, F2, T_out), jnp.float32),
        "be2": 0.1 * jax.random.normal(keys[7], (out_c, F2, T_out), jnp.float32),
    }
    x = jax.random.normal(keys[8], (N, in_c, in_f, in_t), jnp.float32)

    ref = reference(x, params, kernel_size=K, stride=stride, relu_after_bn=False)

    # Bit-tight check: f32 compute path against the f32 reference.
    out_f32 = jax.block_until_ready(
        separable_conv2d(x, params, kernel_size=K, stride=stride,
                         relu_after_bn=False, compute_dtype=jnp.float32))
    np.testing.assert_allclose(np.asarray(out_f32), np.asarray(ref),
                               atol=1e-4, rtol=1e-4)

    # Default perf path: bf16 im2col / conv1-weight stream (LN math stays f32).
    out_bf16 = jax.block_until_ready(
        separable_conv2d(x, params, kernel_size=K, stride=stride,
                         relu_after_bn=False))
    np.testing.assert_allclose(np.asarray(out_bf16), np.asarray(ref),
                               atol=5e-2, rtol=5e-2)

    # TODO(synk): the .hack() mode (weight flipping + implicit conv padding) is a
    # training-time trick outside the default forward(); only the default path is
    # kernelized.
    print("KERNEL_OK")
</pallas_src>

<mosaic_0001>
module attributes {stable_mosaic.version = 11 : i64} {
  func.func @kernel(%arg0: i32, %arg1: memref<16x256xf32, #tpu.memory_space<vmem>>, %arg2: memref<8x16xf32, #tpu.memory_space<vmem>>, %arg3: memref<2x8x128xf32, #tpu.memory_space<vmem>>, %arg4: memref<6x8x64xf32, #tpu.memory_space<vmem>>, %arg5: memref<8x128xf32, #tpu.memory_space<vmem>>) attributes {dimension_semantics = [#tpu.dimension_semantics<parallel>], iteration_bounds = array<i64: 1>, scalar_prefetch = 0 : i64, scratch_operands = 0 : i64, tpu.core_type = #tpu.core_type<tc>, window_params = [{transform_indices = @transform_0, window_bounds = array<i64: 16, 256>}, {pipeline_mode = #tpu.pipeline_mode<synchronous>, transform_indices = @transform_1, window_bounds = array<i64: 8, 16>}, {pipeline_mode = #tpu.pipeline_mode<synchronous>, transform_indices = @transform_2, window_bounds = array<i64: 2, 8, 128>}, {pipeline_mode = #tpu.pipeline_mode<synchronous>, transform_indices = @transform_3, window_bounds = array<i64: 6, 8, 64>}, {transform_indices = @transform_4, window_bounds = array<i64: 8, 128>}]} {
    %c0 = arith.constant 0 : index
    %c0_0 = arith.constant 0 : index
    %0 = vector.load %arg2[%c0, %c0_0] : memref<8x16xf32, #tpu.memory_space<vmem>>, vector<8x16xf32>
    %c0_1 = arith.constant 0 : index
    %c0_2 = arith.constant 0 : index
    %c0_3 = arith.constant 0 : index
    %1 = vector.load %arg3[%c0_1, %c0_2, %c0_3] : memref<2x8x128xf32, #tpu.memory_space<vmem>>, vector<1x8x128xf32>
    %2 = vector.shape_cast %1 : vector<1x8x128xf32> to vector<8x128xf32>
    %c1 = arith.constant 1 : index
    %c0_4 = arith.constant 0 : index
    %c0_5 = arith.constant 0 : index
    %3 = vector.load %arg3[%c1, %c0_4, %c0_5] : memref<2x8x128xf32, #tpu.memory_space<vmem>>, vector<1x8x128xf32>
    %4 = vector.shape_cast %3 : vector<1x8x128xf32> to vector<8x128xf32>
    %c0_6 = arith.constant 0 : index
    %c0_7 = arith.constant 0 : index
    %c0_8 = arith.constant 0 : index
    %5 = vector.load %arg4[%c0_6, %c0_7, %c0_8] : memref<6x8x64xf32, #tpu.memory_space<vmem>>, vector<1x8x64xf32>
    %6 = vector.shape_cast %5 : vector<1x8x64xf32> to vector<8x64xf32>
    %c1_9 = arith.constant 1 : index
    %c0_10 = arith.constant 0 : index
    %c0_11 = arith.constant 0 : index
    %7 = vector.load %arg4[%c1_9, %c0_10, %c0_11] : memref<6x8x64xf32, #tpu.memory_space<vmem>>, vector<1x8x64xf32>
    %8 = vector.shape_cast %7 : vector<1x8x64xf32> to vector<8x64xf32>
    %c2 = arith.constant 2 : index
    %c0_12 = arith.constant 0 : index
    %c0_13 = arith.constant 0 : index
    %9 = vector.load %arg4[%c2, %c0_12, %c0_13] : memref<6x8x64xf32, #tpu.memory_space<vmem>>, vector<1x8x64xf32>
    %10 = vector.shape_cast %9 : vector<1x8x64xf32> to vector<8x64xf32>
    %c3 = arith.constant 3 : index
    %c0_14 = arith.constant 0 : index
    %c0_15 = arith.constant 0 : index
    %11 = vector.load %arg4[%c3, %c0_14, %c0_15] : memref<6x8x64xf32, #tpu.memory_space<vmem>>, vector<1x8x64xf32>
    %12 = vector.shape_cast %11 : vector<1x8x64xf32> to vector<8x64xf32>
    %c4 = arith.constant 4 : index
    %c0_16 = arith.constant 0 : index
    %c0_17 = arith.constant 0 : index
    %13 = vector.load %arg4[%c4, %c0_16, %c0_17] : memref<6x8x64xf32, #tpu.memory_space<vmem>>, vector<1x8x64xf32>
    %14 = vector.shape_cast %13 : vector<1x8x64xf32> to vector<8x64xf32>
    %c5 = arith.constant 5 : index
    %c0_18 = arith.constant 0 : index
    %c0_19 = arith.constant 0 : index
    %15 = vector.load %arg4[%c5, %c0_18, %c0_19] : memref<6x8x64xf32, #tpu.memory_space<vmem>>, vector<1x8x64xf32>
    %16 = vector.shape_cast %15 : vector<1x8x64xf32> to vector<8x64xf32>
    %c0_20 = arith.constant 0 : index
    %c0_21 = arith.constant 0 : index
    %17 = vector.load %arg1[%c0_20, %c0_21] : memref<16x256xf32, #tpu.memory_space<vmem>>, vector<16x256xf32>
    %cst = arith.constant dense<0.000000e+00> : vector<8x256xf32>
    %18 = tpu.matmul %0, %17, %cst {dimension_numbers = #tpu.dot_dimension_numbers<[1], [0], [0], [1], [0, 0, 1, 1], [], []>} : vector<8x16xf32>, vector<16x256xf32>, vector<8x256xf32> -> vector<8x256xf32>
    %19 = vector.extract_strided_slice %18 {offsets = [0, 0], sizes = [8, 128], strides = [1, 1]} : vector<8x256xf32> to vector<8x128xf32>
    %cst_22 = arith.constant 0.000000e+00 : f32
    %20 = vector.broadcast %cst_22 : f32 to vector<8x128xf32>
    %21 = arith.maximumf %19, %20 : vector<8x128xf32>
    %cst_23 = arith.constant dense<0.000000e+00> : vector<8xf32>
    %22 = vector.multi_reduction <add>, %21, %cst_23 [1] : vector<8x128xf32> to vector<8xf32>
    %23 = vector.shape_cast %22 : vector<8xf32> to vector<8x1xf32>
    %cst_24 = arith.constant dense<0.000000e+00> : vector<1xf32>
    %24 = vector.multi_reduction <add>, %23, %cst_24 [0] : vector<8x1xf32> to vector<1xf32>
    %25 = vector.shape_cast %24 : vector<1xf32> to vector<1x1xf32>
    %26 = arith.mulf %21, %21 : vector<8x128xf32>
    %cst_25 = arith.constant dense<0.000000e+00> : vector<8xf32>
    %27 = vector.multi_reduction <add>, %26, %cst_25 [1] : vector<8x128xf32> to vector<8xf32>
    %28 = vector.shape_cast %27 : vector<8xf32> to vector<8x1xf32>
    %cst_26 = arith.constant dense<0.000000e+00> : vector<1xf32>
    %29 = vector.multi_reduction <add>, %28, %cst_26 [0] : vector<8x1xf32> to vector<1xf32>
    %30 = vector.shape_cast %29 : vector<1xf32> to vector<1x1xf32>
    %cst_27 = arith.constant 9.765625E-4 : f32
    %31 = vector.broadcast %cst_27 : f32 to vector<1x1xf32>
    %32 = arith.mulf %25, %31 : vector<1x1xf32>
    %cst_28 = arith.constant 9.765625E-4 : f32
    %33 = vector.broadcast %cst_28 : f32 to vector<1x1xf32>
    %34 = arith.mulf %30, %33 : vector<1x1xf32>
    %35 = arith.mulf %32, %32 : vector<1x1xf32>
    %36 = arith.subf %34, %35 : vector<1x1xf32>
    %cst_29 = arith.constant 0.000000e+00 : f32
    %37 = vector.broadcast %cst_29 : f32 to vector<1x1xf32>
    %38 = arith.maximumf %36, %37 : vector<1x1xf32>
    %39 = vector.broadcast %32 : vector<1x1xf32> to vector<8x128xf32>
    %40 = arith.subf %21, %39 : vector<8x128xf32>
    %cst_30 = arith.constant 9.99999974E-6 : f32
    %41 = vector.broadcast %cst_30 : f32 to vector<1x1xf32>
    %42 = arith.addf %38, %41 : vector<1x1xf32>
    %43 = math.rsqrt %42 : vector<1x1xf32>
    %44 = vector.broadcast %43 : vector<1x1xf32> to vector<8x128xf32>
    %45 = arith.mulf %40, %44 : vector<8x128xf32>
    %46 = arith.mulf %45, %2 : vector<8x128xf32>
    %47 = arith.addf %46, %4 : vector<8x128xf32>
    %48 = vector.extract_strided_slice %47 {offsets = [0, 0], sizes = [8, 64], strides = [1, 1]} : vector<8x128xf32> to vector<8x64xf32>
    %49 = arith.mulf %6, %48 : vector<8x64xf32>
    %50 = arith.addf %12, %49 : vector<8x64xf32>
    %51 = vector.extract_strided_slice %47 {offsets = [0, 64], sizes = [8, 64], strides = [1, 1]} : vector<8x128xf32> to vector<8x64xf32>
    %52 = arith.mulf %8, %51 : vector<8x64xf32>
    %53 = arith.addf %50, %52 : vector<8x64xf32>
    %54 = vector.extract_strided_slice %47 {offsets = [0, 8], sizes = [8, 64], strides = [1, 1]} : vector<8x128xf32> to vector<8x64xf32>
    %55 = arith.mulf %10, %54 : vector<8x64xf32>
    %56 = arith.addf %53, %55 : vector<8x64xf32>
    %cst_31 = arith.constant 0.000000e+00 : f32
    %57 = vector.broadcast %cst_31 : f32 to vector<8x64xf32>
    %58 = arith.maximumf %56, %57 : vector<8x64xf32>
    %cst_32 = arith.constant dense<0.000000e+00> : vector<8xf32>
    %59 = vector.multi_reduction <add>, %58, %cst_32 [1] : vector<8x64xf32> to vector<8xf32>
    %60 = vector.shape_cast %59 : vector<8xf32> to vector<8x1xf32>
    %cst_33 = arith.constant dense<0.000000e+00> : vector<1xf32>
    %61 = vector.multi_reduction <add>, %60, %cst_33 [0] : vector<8x1xf32> to vector<1xf32>
    %62 = vector.shape_cast %61 : vector<1xf32> to vector<1x1xf32>
    %63 = arith.mulf %58, %58 : vector<8x64xf32>
    %cst_34 = arith.constant dense<0.000000e+00> : vector<8xf32>
    %64 = vector.multi_reduction <add>, %63, %cst_34 [1] : vector<8x64xf32> to vector<8xf32>
    %65 = vector.shape_cast %64 : vector<8xf32> to vector<8x1xf32>
    %cst_35 = arith.constant dense<0.000000e+00> : vector<1xf32>
    %66 = vector.multi_reduction <add>, %65, %cst_35 [0] : vector<8x1xf32> to vector<1xf32>
    %67 = vector.shape_cast %66 : vector<1xf32> to vector<1x1xf32>
    %cst_36 = arith.constant 0.001953125 : f32
    %68 = vector.broadcast %cst_36 : f32 to vector<1x1xf32>
    %69 = arith.mulf %62, %68 : vector<1x1xf32>
    %cst_37 = arith.constant 0.001953125 : f32
    %70 = vector.broadcast %cst_37 : f32 to vector<1x1xf32>
    %71 = arith.mulf %67, %70 : vector<1x1xf32>
    %72 = arith.mulf %69, %69 : vector<1x1xf32>
    %73 = arith.subf %71, %72 : vector<1x1xf32>
    %cst_38 = arith.constant 0.000000e+00 : f32
    %74 = vector.broadcast %cst_38 : f32 to vector<1x1xf32>
    %75 = arith.maximumf %73, %74 : vector<1x1xf32>
    %76 = vector.broadcast %69 : vector<1x1xf32> to vector<8x64xf32>
    %77 = arith.subf %58, %76 : vector<8x64xf32>
    %cst_39 = arith.constant 9.99999974E-6 : f32
    %78 = vector.broadcast %cst_39 : f32 to vector<1x1xf32>
    %79 = arith.addf %75, %78 : vector<1x1xf32>
    %80 = math.rsqrt %79 : vector<1x1xf32>
    %81 = vector.broadcast %80 : vector<1x1xf32> to vector<8x64xf32>
    %82 = arith.mulf %77, %81 : vector<8x64xf32>
    %83 = arith.mulf %82, %14 : vector<8x64xf32>
    %84 = arith.addf %83, %16 : vector<8x64xf32>
    %85 = vector.extract_strided_slice %18 {offsets = [0, 128], sizes = [8, 128], strides = [1, 1]} : vector<8x256xf32> to vector<8x128xf32>
    %cst_40 = arith.constant 0.000000e+00 : f32
    %86 = vector.broadcast %cst_40 : f32 to vector<8x128xf32>
    %87 = arith.maximumf %85, %86 : vector<8x128xf32>
    %cst_41 = arith.constant dense<0.000000e+00> : vector<8xf32>
    %88 = vector.multi_reduction <add>, %87, %cst_41 [1] : vector<8x128xf32> to vector<8xf32>
    %89 = vector.shape_cast %88 : vector<8xf32> to vector<8x1xf32>
    %cst_42 = arith.constant dense<0.000000e+00> : vector<1xf32>
    %90 = vector.multi_reduction <add>, %89, %cst_42 [0] : vector<8x1xf32> to vector<1xf32>
    %91 = vector.shape_cast %90 : vector<1xf32> to vector<1x1xf32>
    %92 = arith.mulf %87, %87 : vector<8x128xf32>
    %cst_43 = arith.constant dense<0.000000e+00> : vector<8xf32>
    %93 = vector.multi_reduction <add>, %92, %cst_43 [1] : vector<8x128xf32> to vector<8xf32>
    %94 = vector.shape_cast %93 : vector<8xf32> to vector<8x1xf32>
    %cst_44 = arith.constant dense<0.000000e+00> : vector<1xf32>
    %95 = vector.multi_reduction <add>, %94, %cst_44 [0] : vector<8x1xf32> to vector<1xf32>
    %96 = vector.shape_cast %95 : vector<1xf32> to vector<1x1xf32>
    %cst_45 = arith.constant 9.765625E-4 : f32
    %97 = vector.broadcast %cst_45 : f32 to vector<1x1xf32>
    %98 = arith.mulf %91, %97 : vector<1x1xf32>
    %cst_46 = arith.constant 9.765625E-4 : f32
    %99 = vector.broadcast %cst_46 : f32 to vector<1x1xf32>
    %100 = arith.mulf %96, %99 : vector<1x1xf32>
    %101 = arith.mulf %98, %98 : vector<1x1xf32>
    %102 = arith.subf %100, %101 : vector<1x1xf32>
    %cst_47 = arith.constant 0.000000e+00 : f32
    %103 = vector.broadcast %cst_47 : f32 to vector<1x1xf32>
    %104 = arith.maximumf %102, %103 : vector<1x1xf32>
    %105 = vector.broadcast %98 : vector<1x1xf32> to vector<8x128xf32>
    %106 = arith.subf %87, %105 : vector<8x128xf32>
    %cst_48 = arith.constant 9.99999974E-6 : f32
    %107 = vector.broadcast %cst_48 : f32 to vector<1x1xf32>
    %108 = arith.addf %104, %107 : vector<1x1xf32>
    %109 = math.rsqrt %108 : vector<1x1xf32>
    %110 = vector.broadcast %109 : vector<1x1xf32> to vector<8x128xf32>
    %111 = arith.mulf %106, %110 : vector<8x128xf32>
    %112 = arith.mulf %111, %2 : vector<8x128xf32>
    %113 = arith.addf %112, %4 : vector<8x128xf32>
    %114 = vector.extract_strided_slice %113 {offsets = [0, 0], sizes = [8, 64], strides = [1, 1]} : vector<8x128xf32> to vector<8x64xf32>
    %115 = arith.mulf %6, %114 : vector<8x64xf32>
    %116 = arith.addf %12, %115 : vector<8x64xf32>
    %117 = vector.extract_strided_slice %113 {offsets = [0, 64], sizes = [8, 64], strides = [1, 1]} : vector<8x128xf32> to vector<8x64xf32>
    %118 = arith.mulf %8, %117 : vector<8x64xf32>
    %119 = arith.addf %116, %118 : vector<8x64xf32>
    %120 = vector.extract_strided_slice %113 {offsets = [0, 8], sizes = [8, 64], strides = [1, 1]} : vector<8x128xf32> to vector<8x64xf32>
    %121 = arith.mulf %10, %120 : vector<8x64xf32>
    %122 = arith.addf %119, %121 : vector<8x64xf32>
    %cst_49 = arith.constant 0.000000e+00 : f32
    %123 = vector.broadcast %cst_49 : f32 to vector<8x64xf32>
    %124 = arith.maximumf %122, %123 : vector<8x64xf32>
    %cst_50 = arith.constant dense<0.000000e+00> : vector<8xf32>
    %125 = vector.multi_reduction <add>, %124, %cst_50 [1] : vector<8x64xf32> to vector<8xf32>
    %126 = vector.shape_cast %125 : vector<8xf32> to vector<8x1xf32>
    %cst_51 = arith.constant dense<0.000000e+00> : vector<1xf32>
    %127 = vector.multi_reduction <add>, %126, %cst_51 [0] : vector<8x1xf32> to vector<1xf32>
    %128 = vector.shape_cast %127 : vector<1xf32> to vector<1x1xf32>
    %129 = arith.mulf %124, %124 : vector<8x64xf32>
    %cst_52 = arith.constant dense<0.000000e+00> : vector<8xf32>
    %130 = vector.multi_reduction <add>, %129, %cst_52 [1] : vector<8x64xf32> to vector<8xf32>
    %131 = vector.shape_cast %130 : vector<8xf32> to vector<8x1xf32>
    %cst_53 = arith.constant dense<0.000000e+00> : vector<1xf32>
    %132 = vector.multi_reduction <add>, %131, %cst_53 [0] : vector<8x1xf32> to vector<1xf32>
    %133 = vector.shape_cast %132 : vector<1xf32> to vector<1x1xf32>
    %cst_54 = arith.constant 0.001953125 : f32
    %134 = vector.broadcast %cst_54 : f32 to vector<1x1xf32>
    %135 = arith.mulf %128, %134 : vector<1x1xf32>
    %cst_55 = arith.constant 0.001953125 : f32
    %136 = vector.broadcast %cst_55 : f32 to vector<1x1xf32>
    %137 = arith.mulf %133, %136 : vector<1x1xf32>
    %138 = arith.mulf %135, %135 : vector<1x1xf32>
    %139 = arith.subf %137, %138 : vector<1x1xf32>
    %cst_56 = arith.constant 0.000000e+00 : f32
    %140 = vector.broadcast %cst_56 : f32 to vector<1x1xf32>
    %141 = arith.maximumf %139, %140 : vector<1x1xf32>
    %142 = vector.broadcast %135 : vector<1x1xf32> to vector<8x64xf32>
    %143 = arith.subf %124, %142 : vector<8x64xf32>
    %cst_57 = arith.constant 9.99999974E-6 : f32
    %144 = vector.broadcast %cst_57 : f32 to vector<1x1xf32>
    %145 = arith.addf %141, %144 : vector<1x1xf32>
    %146 = math.rsqrt %145 : vector<1x1xf32>
    %147 = vector.broadcast %146 : vector<1x1xf32> to vector<8x64xf32>
    %148 = arith.mulf %143, %147 : vector<8x64xf32>
    %149 = arith.mulf %148, %14 : vector<8x64xf32>
    %150 = arith.addf %149, %16 : vector<8x64xf32>
    %151 = tpu.concatenate %84, %150 in 1 : vector<8x64xf32>, vector<8x64xf32> -> vector<8x128xf32>
    %c0_58 = arith.constant 0 : index
    %c0_59 = arith.constant 0 : index
    %152 = vector.load %arg5[%c0_58, %c0_59] : memref<8x128xf32, #tpu.memory_space<vmem>>, vector<8x128xf32>
    tpu.vector_store %arg5[%c0_58, %c0_59], %151 {strides = array<i32>} : memref<8x128xf32, #tpu.memory_space<vmem>>, vector<8x128xf32>,
    return
  }
  func.func @transform_0(%arg0: i32) -> (i32, i32) {
    %c0_i32 = arith.constant 0 : i32
    %c0_i32_0 = arith.constant 0 : i32
    return %c0_i32, %arg0 : i32, i32
  }
  func.func @transform_1(%arg0: i32) -> (i32, i32) {
    %c0_i32 = arith.constant 0 : i32
    %c0_i32_0 = arith.constant 0 : i32
    %c0_i32_1 = arith.constant 0 : i32
    return %c0_i32, %c0_i32_0 : i32, i32
  }
  func.func @transform_2(%arg0: i32) -> (i32, i32, i32) {
    %c0_i32 = arith.constant 0 : i32
    %c0_i32_0 = arith.constant 0 : i32
    %c0_i32_1 = arith.constant 0 : i32
    %c0_i32_2 = arith.constant 0 : i32
    return %c0_i32, %c0_i32_0, %c0_i32_1 : i32, i32, i32
  }
  func.func @transform_3(%arg0: i32) -> (i32, i32, i32) {
    %c0_i32 = arith.constant 0 : i32
    %c0_i32_0 = arith.constant 0 : i32
    %c0_i32_1 = arith.constant 0 : i32
    %c0_i32_2 = arith.constant 0 : i32
    return %c0_i32, %c0_i32_0, %c0_i32_1 : i32, i32, i32
  }
  func.func @transform_4(%arg0: i32) -> (i32, i32) {
    %c0_i32 = arith.constant 0 : i32
    %c0_i32_0 = arith.constant 0 : i32
    return %c0_i32, %arg0 : i32, i32
  }
}

</mosaic_0001>

<bundles_post_ra>
// kernel: tpu_custom_call.1
= control target key start
LH: loop header
LB: loop body
LE: loop exit
PB: predicated region body
PF: predicated region fallthrough
CT: control target
= control target key end

     0   :  { %9 = vsyncpa [#allocation3], 0  ;;  %s582_s0 = inlined_call_operand.hbm [shape: f32[16,256], index: 0, kind: input, shape index: {}]   ;;  %s583_s1 = inlined_call_operand.hbm [shape: f32[8,16], index: 1, kind: input, shape index: {}]   ;;  %s584_s2 = inlined_call_operand.hbm [shape: f32[2,8,128], index: 2, kind: input, shape index: {}]   ;;  %s585_s3 = inlined_call_operand.hbm [shape: f32[6,8,64], index: 3, kind: input, shape index: {}]   ;;  %s586_s4 = inlined_call_operand.hbm [shape: f32[8,128], index: 4, kind: output, shape index: {}]  }
   0x1   :  { %10 = vsyncpa [#allocation6], 0 }
   0x2   :  { %11 = vsyncpa [#allocation9], 0  ;;  %s31_s17 = sshll.u32 %s583_s1, 4  ;;  %s32_s17 = int_to_ptr.hbm [resolvable:$true] %s31_s17 }
   0x3   :  { %12 = vsyncpa [#allocation4], 0  ;;  %s499_s18 = smov [#allocation5]   ;;  %s17_s22 = sshll.u32 %s582_s0, 4  ;;  %s18_s22 = int_to_ptr.hbm [resolvable:$true] %s17_s22 }
   0x4   :  { %s33_s19 = sshll.u32 %s499_s18, 4  ;;  %s500_s23 = smov [#allocation2]   ;;  %s34_s19 = int_to_ptr.vmem [resolvable:$true] %s33_s19 }
   0x5   :  { %36 = dma.hbm_to_vmem [thread:$0]  %s32_s17, 128, %s34_s19, [#allocation6]  }
   0x6   :  { %s19_s24 = sshll.u32 %s500_s23, 4  ;;  %s501_s25 = smov 256   ;;  %s20_s24 = int_to_ptr.vmem [resolvable:$true] %s19_s24 }
   0x7   :  { %s502_s26 = smov 16   ;;  %s41_s1 = sshll.u32 %s584_s2, 4  ;;  %s42_s1 = int_to_ptr.hbm [resolvable:$true] %s41_s1 }
   0x8   :  { %25 = dma.hbm_to_vmem [thread:$0]  %s18_s22, 512, %s20_s24, [#allocation3], %s501_s25, %s501_s25, %s502_s26  }
   0x9   :  { %s503_s29 = smov [#allocation7]   ;;  %s54_s0 = sshll.u32 %s585_s3, 4  ;;  %s55_s0 = int_to_ptr.hbm [resolvable:$true] %s54_s0 }
   0xa   :  { %s43_s30 = sshll.u32 %s503_s29, 4  ;;  %s504_s7 = smov 128   ;;  %s44_s30 = int_to_ptr.vmem [resolvable:$true] %s43_s30 }
   0xb   :  { %s505_s8 = smov 8   ;;  %s506_s9 = smov [#allocation8]  }
   0xc   :  { %49 = dma.hbm_to_vmem [thread:$0]  %s42_s1, 256, %s44_s30, [#allocation6], %s504_s7, %s504_s7, %s505_s8  }
   0xd   :  { %s56_s10 = sshll.u32 %s506_s9, 4  ;;  %s57_s10 = int_to_ptr.vmem [resolvable:$true] %s56_s10 }
   0xe   :  { %62 = dma.hbm_to_vmem [thread:$0]  %s55_s0, 768, %s57_s10, [#allocation9], %s504_s7, %s504_s7, %s505_s8  }
   0xf   :  { %491 = dma.done.wait [#allocation3], 512  }
  0x10   :  { %492 = vsyncadd [#allocation3], 4294966784 }
  0x11   :  { %493 = dma.done.wait [#allocation6], 384  }
  0x12   :  { %494 = vsyncadd [#allocation6], 4294966912 }
  0x13   :  { %495 = dma.done.wait [#allocation9], 768  }
  0x14   :  { %496 = vsyncadd [#allocation9], 4294966528  ;;  %v96_v0 = vld [vmem:[#allocation2 + $0x10] sm:$0xff]  ;;  %v97_v1 = vld [vmem:[#allocation2 + $0x18] sm:$0xff]  ;;  %vm98_vm0 = vcmask 130048   ;;  %s507_s2 = smov 64  }
  0x15   :  { %v94_v2 = vld [vmem:[#allocation2] sm:$0xff]  ;;  %116 = vmatpush.msra.mxu0 %v96_v0  ;;  %136 = vmatpush.msra.mxu1 %v97_v1  ;;  %v95_v3 = vld [vmem:[#allocation2 + $0x8] sm:$0xff]  ;;  %s508_s3 = smov 120   ;;  %vm194_vm7 = vcmask 523264   ;;  %s509_s11 = smov [#allocation10]  }
  0x16   :  { %v79_v4 = vld [vmem:[#allocation5] sm:$0xff]  ;;  %v80_v1 = vld [vmem:[#allocation7] sm:$0xff]  ;;  %s336_s12 = sshll.u32 %s509_s11, 4  ;;  %s338_s15 = sshll.u32 %s586_s4, 4  ;;  %s337_s12 = int_to_ptr.vmem [resolvable:$true] %s336_s12  ;;  %s339_s15 = int_to_ptr.hbm [resolvable:$true] %s338_s15 }
  0x17   :  { %117 = vmatpush.msra.mxu0 %v94_v2  ;;  %137 = vmatpush.msra.mxu1 %v95_v3 }
  0x18   :  { %350 = vmatmul.msk.f32.vlgmr.msra.gmra.mxu0 %vm98_vm0, %v79_v4  ;;  %351 = vmatmul.msk.f32.vlgmr.msra.gmra.mxu1 %vm98_vm0, %v79_v4 }
  0x95   :  { %v119_v5 = vpop.f32.mrf.mxu0  ;;  %v139_v6 = vpop.f32.mrf.mxu1 }
  0x96   :  { %v547_v7 = vmax.f32 %v119_v5, 0.0  ;;  %v549_v8 = vmax.f32 %v139_v6, 0.0  ;;  %v82_v5 = vld [vmem:[#allocation7 + $0x8] sm:$0xff] }
  0x98   :  { %235 = vadd.xlane.f32.xlu0 %v549_v8  ;;  %143 = vadd.xlane.f32.xlu1 %v547_v7  ;;  %v151_v9 = vmul.f32 %v547_v7, %v547_v7  ;;  %v243_v10 = vmul.f32 %v549_v8, %v549_v8 }
  0xa0   :  { %244 = vadd.xlane.f32.xlu0 %v243_v10  ;;  %152 = vadd.xlane.f32.xlu1 %v151_v9 }
 0x10b   :  { %v236_v11 = vpop.xlane.xlu0 %235  ;;  %v144_v12 = vpop.xlane.xlu1 %143 }
 0x10c   :  { %v237_v13 = vrot.slane %v236_v11, 4  ;;  %v145_v14 = vrot.slane %v144_v12, 4 }
 0x10e   :  { %v238_v15 = vadd.f32 %v237_v13, %v236_v11  ;;  %v146_v16 = vadd.f32 %v145_v14, %v144_v12  ;;  %v85_v13 = vld [vmem:[#allocation8 + $0x8] sm:$0xff] }
 0x110   :  { %v239_v17 = vrot.slane %v238_v15, 2  ;;  %v147_v18 = vrot.slane %v146_v16, 2 }
 0x112   :  { %v240_v19 = vadd.f32 %v239_v17, %v238_v15  ;;  %v148_v20 = vadd.f32 %v147_v18, %v146_v16  ;;  %v89_v15 = vld [vmem:[#allocation8 + $0x18] sm:$0xff]  ;;  %v87_v17 = vld [vmem:[#allocation8 + $0x10] sm:$0xff] }
 0x113   :  { %v245_v21 = vpop.xlane.xlu0 %244  ;;  %v153_v22 = vpop.xlane.xlu1 %152 }
 0x114   :  { %v246_v23 = vrot.slane %v245_v21, 4  ;;  %v154_v24 = vrot.slane %v153_v22, 4  ;;  %v241_v25 = vrot.slane %v240_v19, 1  ;;  %v149_v26 = vrot.slane %v148_v20, 1 }
 0x116   :  { %v247_v27 = vadd.f32 %v246_v23, %v245_v21  ;;  %v155_v28 = vadd.f32 %v154_v24, %v153_v22  ;;  %v242_v31 = vadd.f32 %v241_v25, %v240_v19  ;;  %v150_v32 = vadd.f32 %v149_v26, %v148_v20 }
 0x118   :  { %v248_v29 = vrot.slane %v247_v27, 2  ;;  %v156_v30 = vrot.slane %v155_v28, 2  ;;  %v252_v35 = vmul.f32 0.0009765625, %v242_v31  ;;  %v160_v36 = vmul.f32 0.0009765625, %v150_v32 }
 0x11a   :  { %v249_v33 = vadd.f32 %v248_v29, %v247_v27  ;;  %v157_v34 = vadd.f32 %v156_v30, %v155_v28  ;;  %v162_v39 = vmul.f32 %v160_v36, %v160_v36  ;;  %v254_v42 = vmul.f32 %v252_v35, %v252_v35 }
 0x11b   :  { %v257_v62 = vsub.f32 %v549_v8, %v252_v35  ;;  %v165_v0 = vsub.f32 %v547_v7, %v160_v36  ;;  %v83_v8 = vld [vmem:[#allocation8] sm:$0xff] }
 0x11c   :  { %v250_v37 = vrot.slane %v249_v33, 1  ;;  %v158_v38 = vrot.slane %v157_v34, 1 }
 0x11e   :  { %v251_v40 = vadd.f32 %v250_v37, %v249_v33  ;;  %v159_v41 = vadd.f32 %v158_v38, %v157_v34 }
 0x120   :  { %v253_v43 = vmul.f32 0.0009765625, %v251_v40  ;;  %v161_v44 = vmul.f32 0.0009765625, %v159_v41 }
 0x122   :  { %v255_v45 = vsub.f32 %v253_v43, %v254_v42  ;;  %v163_v46 = vsub.f32 %v161_v44, %v162_v39 }
 0x124   :  { %v256_v47 = vmax.f32 %v255_v45, 0.0  ;;  %v164_v48 = vmax.f32 %v163_v46, 0.0 }
 0x126   :  { %v258_v49 = vadd.f32 1e-05, %v256_v47  ;;  %v166_v50 = vadd.f32 1e-05, %v164_v48 }
 0x128   :  { %363 = vrsqrt.f32 %v258_v49  ;;  %vm173_vm1 = vweird.f32 %v166_v50  ;;  %vm265_vm4 = vweird.f32 %v258_v49 }
 0x129   :  { %365 = vrsqrt.f32 %v166_v50 }
 0x12e   :  { %v364_v51 = vpop.eup %363 }
 0x12f   :  { %v366_v52 = vpop.eup %365  ;;  %v260_v53 = vmul.f32 %v364_v51, %v258_v49  ;;  %vm266_vm3 = vweird.f32 %v364_v51 }
 0x130   :  { %v168_v54 = vmul.f32 %v366_v52, %v166_v50  ;;  %vm174_vm2 = vweird.f32 %v366_v52  ;;  %vm267_vm6 = vmor %vm265_vm4, %vm266_vm3 }
 0x131   :  { %v261_v55 = vmul.f32 %v364_v51, %v260_v53  ;;  %vm175_vm5 = vmor %vm173_vm1, %vm174_vm2 }
 0x132   :  { %v169_v56 = vmul.f32 %v366_v52, %v168_v54 }
 0x133   :  { %v262_v57 = vmul.f32 0.5, %v261_v55 }
 0x134   :  { %v170_v58 = vmul.f32 0.5, %v169_v56 }
 0x135   :  { %v263_v59 = vsub.f32 1.5, %v262_v57 }
 0x136   :  { %v171_v60 = vsub.f32 1.5, %v170_v58 }
 0x137   :  { %v264_v61 = vmul.f32 %v364_v51, %v263_v59 }
 0x138   :  { %v172_v63 = vmul.f32 %v366_v52, %v171_v60 }
 0x139   :  { %v268_v2 = vsel %vm267_vm6, %v364_v51, %v264_v61 }
 0x13a   :  { %v269_v3 = vmul.f32 %v268_v2, %v257_v62  ;;  %v176_v4 = vsel %vm175_vm5, %v366_v52, %v172_v63 }
 0x13b   :  { %v177_v6 = vmul.f32 %v176_v4, %v165_v0 }
 0x13c   :  { %v270_v9 = vmul.f32 %v269_v3, %v80_v1 }
 0x13d   :  { %v178_v10 = vmul.f32 %v177_v6, %v80_v1 }
 0x13e   :  { %v271_v11 = vadd.f32 %v270_v9, %v82_v5 }
 0x13f   :  { %v179_v12 = vadd.f32 %v178_v10, %v82_v5 }
 0x140   :  { %275 = vrot.lane.b32.xlu2 %v271_v11, %s507_s2  ;;  %v272_v14 = vmul.f32 %v271_v11, %v83_v8 }
 0x141   :  { %188 = vrot.lane.b32.xlu1 %v179_v12, %s508_s3  ;;  %183 = vrot.lane.b32.xlu0 %v179_v12, %s507_s2  ;;  %v180_v27 = vmul.f32 %v179_v12, %v83_v8 }
 0x142   :  { %v273_v18 = vadd.f32 %v272_v14, %v89_v15 }
 0x143   :  { %v181_v30 = vadd.f32 %v180_v27, %v89_v15 }
 0x148   :  { %280 = vrot.lane.b32.xlu2 %v271_v11, %s508_s3 }
 0x19a   :  { %v276_v7 = vpop.permute.xlu2 %275 }
 0x19b   :  { %v278_v16 = vmul.f32 %v276_v7, %v85_v13 }
 0x19d   :  { %v279_v20 = vadd.f32 %v278_v16, %v273_v18 }
 0x1a2   :  { %v281_v19 = vpop.permute.xlu2 %280 }
 0x1a3   :  { %v283_v21 = vmul.f32 %v281_v19, %v87_v17 }
 0x1a5   :  { %v284_v22 = vadd.f32 %v283_v21, %v279_v20 }
 0x1a7   :  { %v561_v23 = vmax.f32 %v284_v22, 0.0  ;;  %v91_v22 = vld [vmem:[#allocation8 + $0x20] sm:$0xff] }
 0x1a9   :  { %v286_v24 = vsel %vm194_vm7, %v561_v23, 0.0  ;;  %v295_v25 = vmul.f32 %v561_v23, %v561_v23 }
 0x1aa   :  { %287 = vadd.xlane.f32.xlu2 %v286_v24 }
 0x1ab   :  { %v296_v26 = vsel %vm194_vm7, %v295_v25, 0.0 }
 0x1ac   :  { %297 = vadd.xlane.f32.xlu0 %v296_v26  ;;  %v93_v26 = vld [vmem:[#allocation8 + $0x28] sm:$0xff] }
 0x1b3   :  { %v189_v28 = vpop.permute.xlu1 %188  ;;  %v184_v29 = vpop.permute.xlu0 %183 }
 0x1b4   :  { %v186_v31 = vmul.f32 %v184_v29, %v85_v13  ;;  %v191_v32 = vmul.f32 %v189_v28, %v87_v17 }
 0x1b6   :  { %v187_v33 = vadd.f32 %v186_v31, %v181_v30 }
 0x1b8   :  { %v192_v34 = vadd.f32 %v191_v32, %v187_v33 }
 0x1ba   :  { %v568_v35 = vmax.f32 %v192_v34, 0.0 }
 0x1bc   :  { %v195_v36 = vsel %vm194_vm7, %v568_v35, 0.0  ;;  %v204_v37 = vmul.f32 %v568_v35, %v568_v35 }
 0x1bd   :  { %196 = vadd.xlane.f32.xlu1 %v195_v36 }
 0x1be   :  { %v205_v38 = vsel %vm194_vm7, %v204_v37, 0.0 }
 0x1bf   :  { %206 = vadd.xlane.f32.xlu2 %v205_v38 }
 0x21d   :  { %v288_v39 = vpop.xlane.xlu2 %287 }
 0x21e   :  { %v289_v40 = vrot.slane %v288_v39, 4 }
 0x21f   :  { %v298_v41 = vpop.xlane.xlu0 %297 }
 0x220   :  { %v290_v42 = vadd.f32 %v289_v40, %v288_v39  ;;  %v299_v43 = vrot.slane %v298_v41, 4 }
 0x222   :  { %v291_v44 = vrot.slane %v290_v42, 2  ;;  %v300_v45 = vadd.f32 %v299_v43, %v298_v41 }
 0x224   :  { %v292_v46 = vadd.f32 %v291_v44, %v290_v42  ;;  %v301_v47 = vrot.slane %v300_v45, 2 }
 0x226   :  { %v293_v48 = vrot.slane %v292_v46, 1  ;;  %v302_v49 = vadd.f32 %v301_v47, %v300_v45 }
 0x228   :  { %v294_v50 = vadd.f32 %v293_v48, %v292_v46  ;;  %v303_v51 = vrot.slane %v302_v49, 1 }
 0x22a   :  { %v305_v52 = vmul.f32 0.001953125, %v294_v50  ;;  %v304_v53 = vadd.f32 %v303_v51, %v302_v49 }
 0x22c   :  { %v307_v54 = vmul.f32 %v305_v52, %v305_v52  ;;  %v306_v55 = vmul.f32 0.001953125, %v304_v53  ;;  %v310_v20 = vsub.f32 %v561_v23, %v305_v52 }
 0x22e   :  { %v308_v56 = vsub.f32 %v306_v55, %v307_v54 }
 0x230   :  { %v309_v57 = vmax.f32 %v308_v56, 0.0  ;;  %v197_v58 = vpop.xlane.xlu1 %196 }
 0x231   :  { %v198_v59 = vrot.slane %v197_v58, 4 }
 0x232   :  { %v311_v60 = vadd.f32 1e-05, %v309_v57  ;;  %v207_v61 = vpop.xlane.xlu2 %206 }
 0x233   :  { %v199_v62 = vadd.f32 %v198_v59, %v197_v58  ;;  %v208_v63 = vrot.slane %v207_v61, 4 }
 0x234   :  { %367 = vrsqrt.f32 %v311_v60  ;;  %vm318_vm9 = vweird.f32 %v311_v60 }
 0x235   :  { %v200_v0 = vrot.slane %v199_v62, 2  ;;  %v209_v1 = vadd.f32 %v208_v63, %v207_v61 }
 0x237   :  { %v201_v2 = vadd.f32 %v200_v0, %v199_v62  ;;  %v210_v3 = vrot.slane %v209_v1, 2 }
 0x239   :  { %v202_v4 = vrot.slane %v201_v2, 1  ;;  %v211_v5 = vadd.f32 %v210_v3, %v209_v1 }
 0x23a   :  { %v368_v6 = vpop.eup %367 }
 0x23b   :  { %v313_v9 = vmul.f32 %v368_v6, %v311_v60  ;;  %v203_v10 = vadd.f32 %v202_v4, %v201_v2  ;;  %v212_v11 = vrot.slane %v211_v5, 1  ;;  %vm319_vm8 = vweird.f32 %v368_v6 }
 0x23c   :  { %vm320_vm10 = vmor %vm318_vm9, %vm319_vm8 }
 0x23d   :  { %v314_v12 = vmul.f32 %v368_v6, %v313_v9  ;;  %v214_v8 = vmul.f32 0.001953125, %v203_v10  ;;  %v213_v7 = vadd.f32 %v212_v11, %v211_v5 }
 0x23f   :  { %v315_v13 = vmul.f32 0.5, %v314_v12  ;;  %v216_v14 = vmul.f32 %v214_v8, %v214_v8  ;;  %v215_v15 = vmul.f32 0.001953125, %v213_v7  ;;  %v219_v23 = vsub.f32 %v568_v35, %v214_v8 }
 0x241   :  { %v217_v16 = vsub.f32 %v215_v15, %v216_v14  ;;  %v316_v17 = vsub.f32 1.5, %v315_v13 }
 0x243   :  { %v218_v18 = vmax.f32 %v217_v16, 0.0  ;;  %v317_v19 = vmul.f32 %v368_v6, %v316_v17 }
 0x245   :  { %v220_v21 = vadd.f32 1e-05, %v218_v18  ;;  %v321_v24 = vsel %vm320_vm10, %v368_v6, %v317_v19 }
 0x246   :  { %v322_v25 = vmul.f32 %v321_v24, %v310_v20 }
 0x247   :  { %369 = vrsqrt.f32 %v220_v21  ;;  %vm227_vm12 = vweird.f32 %v220_v21 }
 0x248   :  { %v323_v27 = vmul.f32 %v322_v25, %v91_v22 }
 0x24a   :  { %v324_v28 = vadd.f32 %v323_v27, %v93_v26 }
 0x24c   :  { %326 = vrot.lane.b32.xlu2 %v324_v28, %s507_s2 }
 0x24d   :  { %v370_v29 = vpop.eup %369 }
 0x24e   :  { %v222_v30 = vmul.f32 %v370_v29, %v220_v21  ;;  %vm228_vm11 = vweird.f32 %v370_v29 }
 0x24f   :  { %vm229_vm13 = vmor %vm227_vm12, %vm228_vm11 }
 0x250   :  { %v223_v31 = vmul.f32 %v370_v29, %v222_v30 }
 0x252   :  { %v224_v32 = vmul.f32 0.5, %v223_v31 }
 0x254   :  { %v225_v33 = vsub.f32 1.5, %v224_v32 }
 0x256   :  { %v226_v34 = vmul.f32 %v370_v29, %v225_v33 }
 0x258   :  { %v230_v36 = vsel %vm229_vm13, %v370_v29, %v226_v34 }
 0x259   :  { %v231_v37 = vmul.f32 %v230_v36, %v219_v23 }
 0x25b   :  { %v232_v38 = vmul.f32 %v231_v37, %v91_v22 }
 0x25d   :  { %v233_v39 = vadd.f32 %v232_v38, %v93_v26 }
 0x2a6   :  { %v327_v40 = vpop.permute.xlu2 %326 }
 0x2a7   :  { %v329_v41 = vsel %vm194_vm7, %v233_v39, %v327_v40 }
 0x2a8   :  { %330 = vst [vmem:[#allocation10] sm:$0xff] %v329_v41 }
 0x2a9   :  { %341 = dma.vmem_to_hbm [thread:$0]  %s337_s12, 128, %s339_s15, [#allocation4]  }
 0x2aa   :  { %497 = dma.done.wait [#allocation4], 128  }
 0x2ab   :  { %498 = vsyncadd [#allocation4], 4294967168 }
 0x2ac   :  { %346 = vsyncpa [#allocation3], 1 }
 0x2ad   :  { %347 = vsyncpa [#allocation6], 1 }
 0x2ae   :  { %348 = vsyncpa [#allocation9], 1 }
 0x2af   :  { %349 = vsyncpa [#allocation4], 1 }

</bundles_post_ra>
